<compile_context>
chip_gen: v7x
topology: tpu7x:2x2x1
jax: 0.10.0
libtpu: 0.0.40
codegen_flags: <defaults>
</compile_context>

<pallas_src>
import functools

import numpy as np
import jax
import jax.numpy as jnp
from jax import lax
from jax.experimental import pallas as pl
from jax.experimental.pallas import tpu as pltpu


# ----------------------------------------------------------------------------
# Host-side persistent homology (no Pallas equivalent: sequential, data
# dependent boundary-matrix reduction).
# ----------------------------------------------------------------------------
def _freudenthal_complex(height, width):
    """Freudenthal triangulation of a height x width grid, row-major vertex ids
    (matches topologylayer.util.construction.init_freudenthal_2d)."""
    simplices = []
    # 0-cells
    for i in range(height):
        for j in range(width):
            simplices.append((i * width + j,))
    # horizontal 1-cells
    for i in range(height):
        for j in range(width - 1):
            ind = i * width + j
            simplices.append((ind, ind + 1))
    # vertical 1-cells
    for i in range(height - 1):
        for j in range(width):
            ind = i * width + j
            simplices.append((ind, ind + width))
    # diagonal 1-cells + 2-cells
    for i in range(height - 1):
        for j in range(width - 1):
            ind = i * width + j
            simplices.append((ind, ind + width + 1))
            simplices.append((ind, ind + 1, ind + width + 1))
            simplices.append((ind, ind + width, ind + width + 1))
    return simplices


def _sublevel_persistence(simplices, vertex_vals, maxdim=1):
    """Z/2 boundary-matrix reduction for the lower-star (sublevel) filtration
    where filt(simplex) = max of its vertex values.
    Returns {dim: [(birth, death), ...]}, death = +inf for essential classes."""
    nsimp = len(simplices)
    vals = np.array([max(vertex_vals[v] for v in s) for s in simplices])
    dims = np.array([len(s) - 1 for s in simplices])

    order = sorted(range(nsimp), key=lambda k: (vals[k], dims[k], k))
    sorted_simplices = [simplices[k] for k in order]
    sorted_vals = vals[order]
    sorted_dims = dims[order]
    index_of = {frozenset(s): idx for idx, s in enumerate(sorted_simplices)}

    pivots = {}   # low row index -> column index
    stored = {}   # column index -> reduced boundary column (set of row indices)
    pairs = []    # (birth_index, death_index)

    for col in range(nsimp):
        s = sorted_simplices[col]
        if len(s) == 1:      # vertices: empty boundary -> positive simplex
            continue
        bcol = set()
        for omit in range(len(s)):
            face = frozenset(s[:omit] + s[omit + 1:])
            bcol.add(index_of[face])
        while bcol:
            low = max(bcol)
            other = pivots.get(low)
            if other is None:
                break
            bcol ^= stored[other]
        if bcol:
            low = max(bcol)
            pivots[low] = col
            stored[col] = bcol
            pairs.append((low, col))
        # else: positive simplex (creates a class)

    paired_births = set(p[0] for p in pairs)
    negative_cols = set(stored.keys())

    dgms = {d: [] for d in range(maxdim + 1)}
    for b_idx, d_idx in pairs:
        d = int(sorted_dims[b_idx])
        if d <= maxdim:
            dgms[d].append((float(sorted_vals[b_idx]), float(sorted_vals[d_idx])))
    # essential classes: positive simplices that are never a pivot row
    for idx in range(nsimp):
        d = int(sorted_dims[idx])
        if d > maxdim or idx in negative_cols or idx in paired_births:
            continue
        dgms[d].append((float(sorted_vals[idx]), np.inf))
    return dgms


def _superlevel_diagrams(f_img, maxdim=1):
    """Superlevel-set persistence diagrams of a 2D image (sublevel of -f,
    signs flipped back), per topologylayer's LevelSetLayer2D(sublevel=False)."""
    h, w = f_img.shape
    simplices = _freudenthal_complex(h, w)
    g = (-np.asarray(f_img, dtype=np.float64)).reshape(-1)  # row-major
    dgms_g = _sublevel_persistence(simplices, g, maxdim=maxdim)
    out = {}
    for d in range(maxdim + 1):
        pairs = dgms_g[d]
        if pairs:
            arr = np.array(pairs, dtype=np.float64)
            out[d] = np.stack([-arr[:, 0], -arr[:, 1]], axis=1)  # (birth, death)
        else:
            out[d] = np.zeros((0, 2), dtype=np.float64)
    return out


def _packed_diagram_plane(beta_np, maxdim=1):
    """Pack the whole batch's H0/H1 diagrams into ONE (2*R, P) float32 plane
    with (8,128)-tile-aligned halves:
         rows [0,        B)      : H0 births      (one row per batch item)
         rows [B,        2*B)    : H1 births
         rows [2*B,      R)      : zero padding   (R = ceil(2B/8)*8)
         rows [R,        R+B)    : H0 deaths
         rows [R+B,      R+2*B)  : H1 deaths
         rows [R+2*B,    2*R)    : zero padding
    Essential (infinite) bars are emitted with death == birth (length 0) and
    all padding is 0.0, so the kernel is a pure sub + reduce (no masking).
    P (persistence-pair axis, lane axis) is padded to a multiple of 128.

    Returns (packed, R_half)."""
    assert maxdim == 1
    B = beta_np.shape[0]
    dgms = [_superlevel_diagrams(beta_np[b], maxdim=maxdim) for b in range(B)]

    maxp = 1
    for b in range(B):
        for d in range(maxdim + 1):
            maxp = max(maxp, dgms[b][d].shape[0])
    p_pad = int(np.ceil(maxp / 128)) * 128
    r_half = int(np.ceil((2 * B) / 8.0)) * 8  # sublane-tile aligned rows per half

    packed = np.zeros((2 * r_half, p_pad), dtype=np.float32)
    for b in range(B):
        for d in range(maxdim + 1):
            pairs = dgms[b][d]
            if pairs.shape[0] == 0:
                continue
            births = pairs[:, 0]
            deaths = np.where(np.isfinite(pairs[:, 1]), pairs[:, 1], pairs[:, 0])
            row = d * B + b                       # H0 rows [0,B), H1 rows [B,2B)
            packed[row, : births.shape[0]] = births.astype(np.float32)
            packed[r_half + row, : deaths.shape[0]] = deaths.astype(np.float32)

    # Invariants the kernel relies on (sum-max identity & max over padded tile):
    lens = packed[:r_half] - packed[r_half:]
    assert np.all(lens >= 0.0), "superlevel bar lengths must be non-negative"
    assert np.all(packed[2 * B:r_half] == 0.0), "birth-half padding must be 0"
    assert np.all(packed[r_half + 2 * B:] == 0.0), "death-half padding must be 0"
    return packed, r_half


# ----------------------------------------------------------------------------
# Pallas kernel: barcode lengths + PartialSum(skip=1) + Sum + batch mean
# ----------------------------------------------------------------------------
def _toploss_kernel(planes_ref, out_ref, *, batch):
    # planes_ref: (2*R, P) f32 in VMEM, R a multiple of 8 (tile aligned).
    #   rows [0, R)   = births (H0 rows [0,B), H1 rows [B,2B), padding 0)
    #   rows [R, 2*R) = deaths (same layout)
    # out_ref: (1, 1) f32 in SMEM
    rows = planes_ref.shape[0]
    half = rows // 2

    births = planes_ref[0:half, :]        # tile-aligned slice -> no relayout
    deaths = planes_ref[half:rows, :]
    lens = births - deaths                # (R, P); padding/essential rows = 0,
                                          # all values non-negative (superlevel)

    # Two fused full-tile lane reductions (one XLU sum, one XLU max).
    row_sums = jnp.sum(lens, axis=1, keepdims=True)   # (R, 1)
    row_maxs = jnp.max(lens, axis=1, keepdims=True)   # (R, 1)

    # PartialSumBarcodeLengths(dim=1, skip=1) == sum - max (lengths >= 0);
    # SumBarcodeLengths(dim=0) == sum.  Select H1 rows for the max with a tiny
    # iota mask; padding rows contribute 0 to both sum and max.
    # TODO(synk): skip > 1 would require an iterated-max / top-k here.
    row_idx = lax.broadcasted_iota(jnp.int32, (half, 1), 0)
    is_h1 = jnp.logical_and(row_idx >= batch, row_idx < 2 * batch)
    per_row = row_sums - jnp.where(is_h1, row_maxs, jnp.float32(0.0))

    # .mean() over the TRUE batch -> scalar stored to SMEM (scale baked in).
    out_ref[0, 0] = jnp.sum(per_row) * jnp.float32(1.0 / batch)


def toploss_pallas(packed_plane, batch):
    """packed_plane: (2*R, P) float32 as produced by _packed_diagram_plane."""
    rows, p = packed_plane.shape
    assert rows % 16 == 0, "births/deaths halves must each be a multiple of 8 rows"
    assert p % 128 == 0, "persistence-pair axis must be lane-padded to 128"
    # v7x has only 64 MiB VMEM (32 MiB default scoped) vs 128 MiB on v5e/v6e:
    # keep the whole-array spec well under that; switch to a lane-axis grid
    # with running sum/max accumulators if P ever grows past this.
    assert rows * p * 4 <= 16 * 1024 * 1024, "diagram slab too large for whole-array VMEM spec"

    cost = pl.CostEstimate(
        flops=3 * rows * p,          # sub + sum + max, all tiny
        transcendentals=0,
        bytes_accessed=rows * p * 4 + 4,
    )
    out = pl.pallas_call(
        functools.partial(_toploss_kernel, batch=batch),
        # No grid: whole-array spec, single DMA in, scalar out via SMEM.
        in_specs=[pl.BlockSpec(memory_space=pltpu.MemorySpace.VMEM)],
        out_specs=pl.BlockSpec(memory_space=pltpu.MemorySpace.SMEM),
        out_shape=jax.ShapeDtypeStruct((1, 1), jnp.float32),
        cost_estimate=cost,
    )(packed_plane)
    return out[0, 0]


def toploss_reference_np(packed_plane, batch):
    rows, _ = packed_plane.shape
    half = rows // 2
    x = packed_plane.astype(np.float64)
    lens = x[:half] - x[half:]
    l0 = lens[0:batch]
    l1 = lens[batch:2 * batch]
    per_batch = (l1.sum(axis=1) - l1.max(axis=1)) + l0.sum(axis=1)
    return per_batch.mean()


# ----------------------------------------------------------------------------
# Input construction (deterministic): circle image + small noise, batched.
# ----------------------------------------------------------------------------
def gen_circle(n):
    ii, jj = np.meshgrid(np.arange(n), np.arange(n), indexing="ij")
    r = np.sqrt((ii - n / 2.0) ** 2 + (jj - n / 2.0) ** 2)
    return np.exp(-((r - n / 3.0) ** 2) / (n * 2)).astype(np.float32)  # (n, n)


if __name__ == "__main__":
    # TODO(synk): the reference forward calls ipdb.set_trace(); debugger hook omitted.
    n = 16        # grid size (original uses 36; small shape for the test)
    B = 2         # batch

    circle = gen_circle(n)                                   # (n, n)
    key = jax.random.PRNGKey(0)
    noise = jax.random.normal(key, (B, n, n), dtype=jnp.float32) * jnp.float32(0.05)
    beta = jnp.asarray(circle)[None, :, :] + noise           # (B, n, n)
    beta_np = np.asarray(jax.device_get(beta))

    # Persistent homology (host side, NumPy) -> one tile-aligned packed plane.
    packed, r_half = _packed_diagram_plane(beta_np, maxdim=1)  # (2*R, P) f32

    loss = toploss_pallas(jnp.asarray(packed), batch=B)
    loss = jax.block_until_ready(loss)

    ref = toploss_reference_np(packed, B)
    assert np.isfinite(float(loss)), "loss is not finite"
    assert abs(float(loss) - float(ref)) < 1e-4, (float(loss), float(ref))

    print("KERNEL_OK")
</pallas_src>

<mosaic_0001>
module attributes {stable_mosaic.version = 11 : i64} {
  func.func @_toploss_kernel(%arg0: memref<16x512xf32, #tpu.memory_space<vmem>>, %arg1: memref<1x1xf32, #tpu.memory_space<smem>>) attributes {dimension_semantics = [], scalar_prefetch = 0 : i64, scratch_operands = 0 : i64, tpu.core_type = #tpu.core_type<tc>} {
    %c0 = arith.constant 0 : index
    %c0_0 = arith.constant 0 : index
    %0 = vector.load %arg0[%c0, %c0_0] : memref<16x512xf32, #tpu.memory_space<vmem>>, vector<8x512xf32>
    %c8 = arith.constant 8 : index
    %c0_1 = arith.constant 0 : index
    %1 = vector.load %arg0[%c8, %c0_1] : memref<16x512xf32, #tpu.memory_space<vmem>>, vector<8x512xf32>
    %2 = arith.subf %0, %1 : vector<8x512xf32>
    %cst = arith.constant dense<0.000000e+00> : vector<8xf32>
    %3 = vector.multi_reduction <add>, %2, %cst [1] : vector<8x512xf32> to vector<8xf32>
    %4 = vector.shape_cast %3 : vector<8xf32> to vector<8x1xf32>
    %cst_2 = arith.constant dense<0xFF800000> : vector<8xf32>
    %5 = vector.multi_reduction <maximumf>, %2, %cst_2 [1] : vector<8x512xf32> to vector<8xf32>
    %6 = vector.shape_cast %5 : vector<8xf32> to vector<8x1xf32>
    %7 = tpu.iota {dimensions = array<i32: 0>} : vector<8x1xi32>
    %c2_i32 = arith.constant 2 : i32
    %8 = vector.broadcast %c2_i32 : i32 to vector<8x1xi32>
    %9 = arith.cmpi sge, %7, %8 : vector<8x1xi32>
    %c4_i32 = arith.constant 4 : i32
    %10 = vector.broadcast %c4_i32 : i32 to vector<8x1xi32>
    %11 = arith.cmpi slt, %7, %10 : vector<8x1xi32>
    %12 = arith.andi %9, %11 : vector<8x1xi1>
    %cst_3 = arith.constant 0.000000e+00 : f32
    %13 = vector.broadcast %cst_3 : f32 to vector<8x1xf32>
    %14 = arith.select %12, %6, %13 : vector<8x1xi1>, vector<8x1xf32>
    %15 = arith.subf %4, %14 : vector<8x1xf32>
    %16 = vector.shape_cast %15 : vector<8x1xf32> to vector<1x8x1xf32>
    %cst_4 = arith.constant dense<0.000000e+00> : vector<1xf32>
    %17 = vector.multi_reduction <add>, %16, %cst_4 [1, 2] : vector<1x8x1xf32> to vector<1xf32>
    %18 = vector.shape_cast %17 : vector<1xf32> to vector<1x1x1xf32>
    %19 = vector.extract %18[0, 0, 0] : f32 from vector<1x1x1xf32>
    %cst_5 = arith.constant 5.000000e-01 : f32
    %20 = arith.mulf %19, %cst_5 : f32
    %c0_6 = arith.constant 0 : index
    %c0_7 = arith.constant 0 : index
    %21 = memref.load %arg1[%c0_6, %c0_7] : memref<1x1xf32, #tpu.memory_space<smem>>
    memref.store %20, %arg1[%c0_6, %c0_7] : memref<1x1xf32, #tpu.memory_space<smem>>
    return
  }
}

</mosaic_0001>

<bundles_post_ra>
// kernel: tpu_custom_call.1
= control target key start
LH: loop header
LB: loop body
LE: loop exit
PB: predicated region body
PF: predicated region fallthrough
CT: control target
= control target key end

     0   :  { %6 = vsyncpa [#allocation3], 0  ;;  %s160_s0 = inlined_call_operand.hbm [shape: f32[16,512], index: 0, kind: input, shape index: {}]   ;;  %s161_s1 = inlined_call_operand.hbm [shape: f32[1,1], index: 1, kind: output, shape index: {}]  }
   0x1   :  { %7 = vsyncpa [#allocation4], 0  ;;  %s122_s6 = smov [#allocation2]   ;;  %s86_s10 = scalar_lea.hbm %s160_s0, 1024 }
   0x2   :  { %s13_s7 = sshll.u32 %s122_s6, 4  ;;  %p87_p0 = scmp.ne.s32.totalorder %s160_s0, %s86_s10  ;;  %s14_s7 = int_to_ptr.vmem [resolvable:$true] %s13_s7 }
   0x3   :  { %p90_p1 = scmp.lt.u32.totalorder %s86_s10, %s160_s0 }
   0x5   :  { %p92_p2 = pnand %p90_p1, %p87_p0 }
   0x7   :  { %95 = shalt.err (!%p92_p2)
}
   0x8   :  { %s96_s15 = scalar_lea.vmem %s14_s7, 1024  ;;  %p101_p4 = scmp.lt.s32.totalorder %s14_s7, %s14_s7 }
   0x9   :  { %p97_p3 = scmp.ne.s32.totalorder %s14_s7, %s96_s15  ;;  %p102_p5 = scmp.lt.s32.totalorder %s96_s15, %s96_s15 }
   0xb   :  { %p103_p6 = por %p102_p5, %p101_p4 }
   0xd   :  { %p104_p7 = pnand %p103_p6, %p97_p3 }
   0xf   :  { %107 = shalt.err (!%p104_p7)
}
  0x10   :  { %s123_s16 = smov 512   ;;  %s124_s17 = smov 32  }
  0x11   :  { %19 = dma.hbm_to_vmem [thread:$0]  %s160_s0, 1024, %s14_s7, [#allocation3], %s123_s16, %s123_s16, %s124_s17  }
  0x12   :  { %118 = dma.done.wait [#allocation3], 1024  }
  0x13   :  { %119 = vsyncadd [#allocation3], 4294966272  ;;  %v23_v0 = vld [vmem:[#allocation2] sm:$0xff]  ;;  %v24_v1 = vld [vmem:[#allocation2 + $0x8] sm:$0xff]  ;;  %v45_v18 = vlaneseq  ;;  %vm52_vm3 = vcmask 7168   ;;  %s108_s23 = scalar_lea.hbm %s161_s1, 16 }
  0x14   :  { %v25_v2 = vld [vmem:[#allocation2 + $0x10] sm:$0xff]  ;;  %v26_v3 = vld [vmem:[#allocation2 + $0x18] sm:$0xff]  ;;  %v27_v4 = vld [vmem:[#allocation2 + $0x20] sm:$0xff]  ;;  %p109_p8 = scmp.ne.s32.totalorder %s161_s1, %s108_s23  ;;  %p112_p9 = scmp.lt.u32.totalorder %s108_s23, %s161_s1 }
  0x15   :  { %v28_v5 = vld [vmem:[#allocation2 + $0x28] sm:$0xff]  ;;  %v29_v6 = vld [vmem:[#allocation2 + $0x30] sm:$0xff]  ;;  %v30_v7 = vld [vmem:[#allocation2 + $0x38] sm:$0xff]  ;;  %v31_v8 = vsub.f32 %v23_v0, %v27_v4  ;;  %v46_v19 = vshrl.u32 %v45_v18, 7 }
  0x16   :  { %v32_v9 = vsub.f32 %v24_v1, %v28_v5  ;;  %v33_v10 = vsub.f32 %v25_v2, %v29_v6  ;;  %v34_v11 = vsub.f32 %v26_v3, %v30_v7  ;;  %p114_p10 = pnand %p112_p9, %p109_p8 }
  0x17   :  { %vm47_vm0 = vcmp.ge.s32.totalorder %v46_v19, 2  ;;  %vm48_vm1 = vcmp.lt.s32.totalorder %v46_v19, 4 }
  0x18   :  { %v40_v12 = vmax.f32 %v31_v8, %v32_v9  ;;  %v35_v13 = vadd.f32 %v32_v9, %v31_v8  ;;  %v41_v14 = vmax.f32 %v33_v10, %v34_v11  ;;  %vm49_vm2 = vmand %vm47_vm0, %vm48_vm1 }
  0x1a   :  { %v36_v15 = vadd.f32 %v35_v13, %v33_v10  ;;  %v42_v16 = vmax.f32 %v40_v12, %v41_v14 }
  0x1c   :  { %43 = vmax.xlane.f32.xlu0 %v42_v16  ;;  %v37_v17 = vadd.f32 %v36_v15, %v34_v11 }
  0x20   :  { %38 = vadd.xlane.f32.xlu0 %v37_v17 }
  0xa9   :  { %v44_v20 = vpop.xlane.xlu0 %43 }
  0xaa   :  { %v50_v21 = vsel %vm49_vm2, %v44_v20, 0.0 }
  0xad   :  { %v39_v22 = vpop.xlane.xlu0 %38 }
  0xae   :  { %v51_v23 = vsub.f32 %v39_v22, %v50_v21 }
  0xb0   :  { %v53_v24 = vsel %vm52_vm3, %v51_v23, 0.0 }
  0xb1   :  { %54 = vadd.xlane.f32.xlu1 %v53_v24 }
 0x13e   :  { %v55_v25 = vpop.xlane.xlu1 %54 }
 0x13f   :  { %v56_v26 = vrot.slane %v55_v25, 4 }
 0x141   :  { %v57_v27 = vadd.f32 %v56_v26, %v55_v25 }
 0x143   :  { %v58_v28 = vrot.slane %v57_v27, 2 }
 0x145   :  { %v59_v29 = vadd.f32 %v58_v28, %v57_v27 }
 0x147   :  { %v60_v30 = vrot.slane %v59_v29, 1 }
 0x149   :  { %v61_v31 = vadd.f32 %v60_v30, %v59_v29 }
 0x14b   :  { %80 = vpush %v61_v31 }
 0x17c   :  { %s81_s0 = spop %80 }
 0x17d   :  { %s63_s20 = smul.f32 0.5, %s81_s0 }
 0x17f   :  { %65 = sst [smem:[#allocation5]] %s63_s20 }
 0x180   :  { %117 = shalt.err (!%p114_p10)
}
 0x181   :  { %s125_s28 = smov [#allocation5]  }
 0x182   :  { %73 = dma.smem_to_hbm %s125_s28, 16, %s161_s1, [#allocation4]  }
 0x183   :  { %120 = dma.done.wait [#allocation4], 16  }
 0x184   :  { %121 = vsyncadd [#allocation4], 4294967280 }
 0x185   :  { %77 = sfence }
 0x186   :  { %78 = vsyncpa [#allocation3], 1 }
 0x187   :  { %79 = vsyncpa [#allocation4], 1 }

</bundles_post_ra>
